<compile_context>
chip_gen: v7x
topology: tpu7x:2x2x1
jax: 0.10.0
libtpu: 0.0.40
codegen_flags: <defaults>
</compile_context>

<pallas_src>
import functools

import jax
import jax.numpy as jnp
from jax.experimental import pallas as pl
from jax.experimental.pallas import tpu as pltpu

IGNORE_INDEX = 255
LANES = 128
MAX_SUBLANES = 512            # spatial-tile cap (sublanes); 512*128 px per tile


def _weighted_ce_kernel(logits_ref, target_ref, sum_ref, cnt_ref, *, ignore_index):
    """One (batch, spatial-tile) grid cell: per-lane partial NLL sum + count.

    logits_ref: (1, C, s_blk, 128)   native dtype (f32 / bf16)
    target_ref: (1, 1, s_blk, 128)   integer dtype (int32 / uint8 / ...)
    sum_ref, cnt_ref: (1, 1, 128)    f32 partial outputs
    """
    C = logits_ref.shape[1]

    t = target_ref[0, 0].astype(jnp.int32)           # (s_blk, 128)
    valid = t != ignore_index                        # (s_blk, 128) bool

    # Pass 1: running channel max in the logits' native dtype (bf16 VALU on
    # v6e/v7x halves the VALU cost of this pass; exact, since max is order-free).
    m = logits_ref[0, 0]
    for c in range(1, C):
        m = jnp.maximum(m, logits_ref[0, c])
    m32 = m.astype(jnp.float32)                      # (s_blk, 128)

    # Pass 2: fused sum(exp(x - m)) accumulation (f32) and target-class logit
    # gather via a select against the static channel index.  No broadcasted
    # iota, no float one-hot, no materialized f32 copy of the tile.
    se = jnp.zeros(m32.shape, jnp.float32)
    xt = jnp.zeros_like(m)                           # native-dtype select chain
    for c in range(C):
        xc = logits_ref[0, c]                        # (s_blk, 128) native dtype
        se = se + jnp.exp(xc.astype(jnp.float32) - m32)
        xt = jnp.where(t == c, xc, xt)

    nll = m32 + jnp.log(se) - xt.astype(jnp.float32)     # (s_blk, 128)

    # Mask with a select (not a multiply): the last spatial tile may have read
    # out-of-bounds logits garbage (possibly NaN/Inf); its target rows carry
    # ignore_index, so the select drops them before the reduction.
    zeros = jnp.zeros_like(nll)
    masked_nll = jnp.where(valid, nll, zeros)
    sum_ref[...] = jnp.sum(masked_nll, axis=0, keepdims=True)[None]        # (1,1,128)
    cnt_ref[...] = jnp.sum(valid.astype(jnp.float32),
                           axis=0, keepdims=True)[None]                    # (1,1,128)


def _vmem_limit_bytes():
    """Generation-aware scoped-VMEM request (v5e/v6e: 96 MiB, v7x: 48 MiB)."""
    cap = 64 * 1024 * 1024
    try:
        info = pltpu.get_tpu_info()
        cap = int(getattr(info, "vmem_capacity_bytes", cap))
    except Exception:
        pass
    return int(min(cap * 3 // 4, 96 * 1024 * 1024))


def _choose_spatial_tile(hw_sub, num_classes, logit_itemsize, target_itemsize,
                         budget_bytes):
    """Sublane extent of a spatial tile (pixels per tile = s_blk * 128).

    Budgets the double-buffered logits + target input blocks PLUS ~8 f32
    tile-sized in-kernel live values (m, sum-exp, x_t, nll, masks, ...) against
    `budget_bytes` (half of the requested scoped-VMEM limit, for headroom).
    """
    per_sublane = (2 * num_classes * LANES * logit_itemsize   # logits, double-buffered
                   + 2 * LANES * target_itemsize              # targets, double-buffered
                   + 8 * LANES * 4)                           # f32 in-kernel live values
    s_blk = min(MAX_SUBLANES, budget_bytes // per_sublane)
    if s_blk >= hw_sub:
        return hw_sub                       # one full-extent tile per image
    if s_blk >= 32:
        return (s_blk // 32) * 32           # multiple of 32: packed-int8-tile friendly
    return max(8, (s_blk // 8) * 8)


def weighted_ce_loss_pallas(logits_nchw, target_nhw, loss_weight,
                            ignore_index=IGNORE_INDEX,
                            spatial_tile_sublanes=None):
    """Mean cross-entropy over non-ignored pixels, scaled by loss_weight."""
    N, C, H, W = logits_nchw.shape
    HW = H * W

    # Keep logits in their native dtype in HBM (bf16 in training); cast per
    # channel-slice inside the kernel.  The NCHW -> (N, C, HW) reshape is free.
    logits = logits_nchw.reshape(N, C, HW)
    target = target_nhw.reshape(N, HW)

    # Keep the target in its native narrow integer dtype when it can represent
    # ignore_index (uint8 labels => 4x less target HBM traffic); widen in-kernel.
    if not jnp.issubdtype(target.dtype, jnp.integer):
        target = target.astype(jnp.int32)
    else:
        info = jnp.iinfo(target.dtype)
        if not (info.min <= ignore_index <= info.max):
            target = target.astype(jnp.int32)

    hw_sub = pl.cdiv(HW, LANES)
    HW128 = hw_sub * LANES
    if HW128 != HW:
        # TODO(synk): non-lane-aligned spatial sizes (rare for segmentation)
        # still pay one full logits copy; avoiding it needs a 3-D block layout
        # that sacrifices the channel-leading sublane-dense tiles.
        logits = jnp.pad(logits, ((0, 0), (0, 0), (0, HW128 - HW)))
    logits4 = logits.reshape(N, C, hw_sub, LANES)

    vmem_limit = _vmem_limit_bytes()
    itemsize = jnp.dtype(logits.dtype).itemsize
    t_itemsize = jnp.dtype(target.dtype).itemsize
    if spatial_tile_sublanes is not None:
        s_blk = max(1, min(int(spatial_tile_sublanes), hw_sub))
    else:
        s_blk = _choose_spatial_tile(hw_sub, C, itemsize, t_itemsize,
                                     vmem_limit // 2)
    S = pl.cdiv(hw_sub, s_blk)

    # Pad ONLY the cheap target out to the full grid extent with ignore_index;
    # the last logits tile may read out of bounds and is masked in the kernel.
    sub_pad = S * s_blk
    pad_px = sub_pad * LANES - target.shape[1]
    if pad_px:
        target = jnp.pad(target, ((0, 0), (0, pad_px)),
                         constant_values=ignore_index)
    target4 = target.reshape(N, 1, sub_pad, LANES)

    kernel = functools.partial(_weighted_ce_kernel, ignore_index=int(ignore_index))

    sum_out, cnt_out = pl.pallas_call(
        kernel,
        out_shape=(jax.ShapeDtypeStruct((N, S, LANES), jnp.float32),
                   jax.ShapeDtypeStruct((N, S, LANES), jnp.float32)),
        grid_spec=pltpu.PrefetchScalarGridSpec(
            num_scalar_prefetch=0,
            grid=(N, S),
            in_specs=[
                pl.BlockSpec((1, C, s_blk, LANES), lambda n, s: (n, 0, s, 0)),
                pl.BlockSpec((1, 1, s_blk, LANES), lambda n, s: (n, 0, s, 0)),
            ],
            out_specs=[
                pl.BlockSpec((1, 1, LANES), lambda n, s: (n, s, 0)),
                pl.BlockSpec((1, 1, LANES), lambda n, s: (n, s, 0)),
            ],
        ),
        compiler_params=pltpu.CompilerParams(
            # Every grid cell writes its own output block -> fully parallel
            # (both TensorCores on v7x; no serial accumulator).
            dimension_semantics=("parallel", "parallel"),
            vmem_limit_bytes=vmem_limit),
    )(logits4, target4)

    total = jnp.sum(sum_out, dtype=jnp.float32)
    count = jnp.sum(cnt_out, dtype=jnp.float32)
    loss = total / jnp.maximum(count, 1.0)
    return jnp.asarray(loss_weight, jnp.float32) * loss


class BaseWeightedLossPallas:
    """Mirrors BaseWeightedLoss.forward bookkeeping around the Pallas hot path."""

    def __init__(self, reduction="mean", loss_weight=1.0, ignore_index=255,
                 loss_jitter_prob=None, loss_jitter_momentum=0.1):
        assert reduction == "mean"
        self.ignore_index = ignore_index
        self._loss_weight = float(loss_weight)   # constant scalar scheduler
        self._iter = 0
        self._last_loss_weight = 0.0
        self._epoch_size = 1
        # TODO(synk): loss jitter path (torch.normal + host-side EMA via .item())
        # is stateful host RNG; disabled here (loss_jitter_prob=None default).
        assert loss_jitter_prob is None
        assert 0.0 < loss_jitter_momentum < 1.0

    def set_step_params(self, init_iter, epoch_size):
        assert init_iter >= 0 and epoch_size > 0
        self._iter = init_iter
        self._epoch_size = epoch_size

    def forward(self, logits_nchw, target_nhw):
        # _forward: pixel CE with ignore_index + mean reduction (in Pallas);
        # the loss_weight scaling of BaseWeightedLoss.forward is a trivial
        # scalar multiply applied in the wrapper.
        self._last_loss_weight = self._loss_weight   # constant scheduler(iter, epoch_size)
        out_loss = weighted_ce_loss_pallas(logits_nchw, target_nhw,
                                           self._last_loss_weight,
                                           ignore_index=self.ignore_index)
        meta = {}   # concrete _forward returns empty meta
        self._iter += 1
        return out_loss, meta


def _reference_loss(logits_nchw, target_nhw, loss_weight, ignore_index=IGNORE_INDEX):
    # pure-JAX reference for a sanity check
    x = logits_nchw.astype(jnp.float32)
    logp = jax.nn.log_softmax(x, axis=1)                      # (N,C,H,W)
    t = target_nhw.astype(jnp.int32)
    valid = (t != ignore_index)
    t_safe = jnp.where(valid, t, 0)
    picked = jnp.take_along_axis(logp, t_safe[:, None], axis=1)[:, 0]  # (N,H,W)
    nll = -picked * valid.astype(jnp.float32)
    denom = jnp.maximum(valid.sum().astype(jnp.float32), 1.0)
    return jnp.float32(loss_weight) * nll.sum() / denom


if __name__ == "__main__":
    key = jax.random.PRNGKey(0)
    k1, k2 = jax.random.split(key)

    # Case 1: small NCHW (2, 4, 16, 16) f32, int32 targets, single full-extent tile.
    N, C, H, W = 2, 4, 16, 16
    logits = jax.random.normal(k1, (N, C, H, W), dtype=jnp.float32)
    target = jax.random.randint(k2, (N, H, W), 0, C, dtype=jnp.int32)
    target = target.at[:, :2, :3].set(IGNORE_INDEX)   # deterministic ignore pixels

    loss_mod = BaseWeightedLossPallas(reduction="mean", loss_weight=1.0,
                                      ignore_index=IGNORE_INDEX)
    loss_mod.set_step_params(init_iter=0, epoch_size=10)

    out_loss, meta = loss_mod.forward(logits, target)
    out_loss = jax.block_until_ready(out_loss)
    ref = jax.block_until_ready(_reference_loss(logits, target, 1.0, IGNORE_INDEX))
    assert jnp.allclose(out_loss, ref, rtol=1e-5, atol=1e-5), (out_loss, ref)

    # Case 2: bf16 logits, uint8 targets, forced small tile -> exercises the
    # multi-tile parallel grid, a partial (out-of-bounds) last spatial tile with
    # in-kernel ignore-masking, native-bf16 max/select, and in-kernel target
    # widening.  HW = 6400 is lane-aligned, so the logits are never padded.
    k3, k4 = jax.random.split(k1)
    N2, C2, H2, W2 = 2, 5, 80, 80
    logits2 = jax.random.normal(k3, (N2, C2, H2, W2), dtype=jnp.bfloat16)
    target2 = jax.random.randint(k4, (N2, H2, W2), 0, C2, dtype=jnp.int32)
    target2 = target2.at[:, :5, :].set(IGNORE_INDEX).astype(jnp.uint8)

    out2 = jax.block_until_ready(
        weighted_ce_loss_pallas(logits2, target2, 0.5,
                                ignore_index=IGNORE_INDEX,
                                spatial_tile_sublanes=32))
    ref2 = jax.block_until_ready(_reference_loss(logits2, target2, 0.5, IGNORE_INDEX))
    assert jnp.allclose(out2, ref2, rtol=1e-4, atol=1e-4), (out2, ref2)

    print("KERNEL_OK")
</pallas_src>

<mosaic_0001>
module attributes {stable_mosaic.version = 11 : i64} {
  func.func @_weighted_ce_kernel(%arg0: i32, %arg1: i32, %arg2: memref<1x4x2x128xf32, #tpu.memory_space<vmem>>, %arg3: memref<1x1x2x128xi32, #tpu.memory_space<vmem>>, %arg4: memref<1x1x128xf32, #tpu.memory_space<vmem>>, %arg5: memref<1x1x128xf32, #tpu.memory_space<vmem>>) attributes {dimension_semantics = [#tpu.dimension_semantics<parallel>, #tpu.dimension_semantics<parallel>], iteration_bounds = array<i64: 2, 1>, scalar_prefetch = 0 : i64, scratch_operands = 0 : i64, tpu.core_type = #tpu.core_type<tc>, window_params = [{transform_indices = @transform_0, window_bounds = array<i64: 1, 4, 2, 128>}, {transform_indices = @transform_1, window_bounds = array<i64: 1, 1, 2, 128>}, {transform_indices = @transform_2, window_bounds = array<i64: 1, 1, 128>}, {transform_indices = @transform_3, window_bounds = array<i64: 1, 1, 128>}]} {
    %c0 = arith.constant 0 : index
    %c0_0 = arith.constant 0 : index
    %c0_1 = arith.constant 0 : index
    %c0_2 = arith.constant 0 : index
    %0 = vector.load %arg3[%c0, %c0_0, %c0_1, %c0_2] : memref<1x1x2x128xi32, #tpu.memory_space<vmem>>, vector<1x1x2x128xi32>
    %1 = vector.shape_cast %0 : vector<1x1x2x128xi32> to vector<2x128xi32>
    %c255_i32 = arith.constant 255 : i32
    %2 = vector.broadcast %c255_i32 : i32 to vector<2x128xi32>
    %3 = arith.cmpi ne, %1, %2 : vector<2x128xi32>
    %c0_3 = arith.constant 0 : index
    %c0_4 = arith.constant 0 : index
    %c0_5 = arith.constant 0 : index
    %c0_6 = arith.constant 0 : index
    %4 = vector.load %arg2[%c0_3, %c0_4, %c0_5, %c0_6] : memref<1x4x2x128xf32, #tpu.memory_space<vmem>>, vector<1x1x2x128xf32>
    %5 = vector.shape_cast %4 : vector<1x1x2x128xf32> to vector<2x128xf32>
    %c0_7 = arith.constant 0 : index
    %c1 = arith.constant 1 : index
    %c0_8 = arith.constant 0 : index
    %c0_9 = arith.constant 0 : index
    %6 = vector.load %arg2[%c0_7, %c1, %c0_8, %c0_9] : memref<1x4x2x128xf32, #tpu.memory_space<vmem>>, vector<1x1x2x128xf32>
    %7 = vector.shape_cast %6 : vector<1x1x2x128xf32> to vector<2x128xf32>
    %8 = arith.maximumf %5, %7 : vector<2x128xf32>
    %c0_10 = arith.constant 0 : index
    %c2 = arith.constant 2 : index
    %c0_11 = arith.constant 0 : index
    %c0_12 = arith.constant 0 : index
    %9 = vector.load %arg2[%c0_10, %c2, %c0_11, %c0_12] : memref<1x4x2x128xf32, #tpu.memory_space<vmem>>, vector<1x1x2x128xf32>
    %10 = vector.shape_cast %9 : vector<1x1x2x128xf32> to vector<2x128xf32>
    %11 = arith.maximumf %8, %10 : vector<2x128xf32>
    %c0_13 = arith.constant 0 : index
    %c3 = arith.constant 3 : index
    %c0_14 = arith.constant 0 : index
    %c0_15 = arith.constant 0 : index
    %12 = vector.load %arg2[%c0_13, %c3, %c0_14, %c0_15] : memref<1x4x2x128xf32, #tpu.memory_space<vmem>>, vector<1x1x2x128xf32>
    %13 = vector.shape_cast %12 : vector<1x1x2x128xf32> to vector<2x128xf32>
    %14 = arith.maximumf %11, %13 : vector<2x128xf32>
    %cst = arith.constant 0.000000e+00 : f32
    %15 = vector.broadcast %cst : f32 to vector<2x128xf32>
    %cst_16 = arith.constant 0.000000e+00 : f32
    %16 = vector.broadcast %cst_16 : f32 to vector<2x128xf32>
    %c0_17 = arith.constant 0 : index
    %c0_18 = arith.constant 0 : index
    %c0_19 = arith.constant 0 : index
    %c0_20 = arith.constant 0 : index
    %17 = vector.load %arg2[%c0_17, %c0_18, %c0_19, %c0_20] : memref<1x4x2x128xf32, #tpu.memory_space<vmem>>, vector<1x1x2x128xf32>
    %18 = vector.shape_cast %17 : vector<1x1x2x128xf32> to vector<2x128xf32>
    %19 = arith.subf %18, %14 : vector<2x128xf32>
    %20 = math.exp %19 : vector<2x128xf32>
    %21 = arith.addf %15, %20 : vector<2x128xf32>
    %c0_i32 = arith.constant 0 : i32
    %22 = vector.broadcast %c0_i32 : i32 to vector<2x128xi32>
    %23 = arith.cmpi eq, %1, %22 : vector<2x128xi32>
    %24 = arith.select %23, %18, %16 : vector<2x128xi1>, vector<2x128xf32>
    %c0_21 = arith.constant 0 : index
    %c1_22 = arith.constant 1 : index
    %c0_23 = arith.constant 0 : index
    %c0_24 = arith.constant 0 : index
    %25 = vector.load %arg2[%c0_21, %c1_22, %c0_23, %c0_24] : memref<1x4x2x128xf32, #tpu.memory_space<vmem>>, vector<1x1x2x128xf32>
    %26 = vector.shape_cast %25 : vector<1x1x2x128xf32> to vector<2x128xf32>
    %27 = arith.subf %26, %14 : vector<2x128xf32>
    %28 = math.exp %27 : vector<2x128xf32>
    %29 = arith.addf %21, %28 : vector<2x128xf32>
    %c1_i32 = arith.constant 1 : i32
    %30 = vector.broadcast %c1_i32 : i32 to vector<2x128xi32>
    %31 = arith.cmpi eq, %1, %30 : vector<2x128xi32>
    %32 = arith.select %31, %26, %24 : vector<2x128xi1>, vector<2x128xf32>
    %c0_25 = arith.constant 0 : index
    %c2_26 = arith.constant 2 : index
    %c0_27 = arith.constant 0 : index
    %c0_28 = arith.constant 0 : index
    %33 = vector.load %arg2[%c0_25, %c2_26, %c0_27, %c0_28] : memref<1x4x2x128xf32, #tpu.memory_space<vmem>>, vector<1x1x2x128xf32>
    %34 = vector.shape_cast %33 : vector<1x1x2x128xf32> to vector<2x128xf32>
    %35 = arith.subf %34, %14 : vector<2x128xf32>
    %36 = math.exp %35 : vector<2x128xf32>
    %37 = arith.addf %29, %36 : vector<2x128xf32>
    %c2_i32 = arith.constant 2 : i32
    %38 = vector.broadcast %c2_i32 : i32 to vector<2x128xi32>
    %39 = arith.cmpi eq, %1, %38 : vector<2x128xi32>
    %40 = arith.select %39, %34, %32 : vector<2x128xi1>, vector<2x128xf32>
    %c0_29 = arith.constant 0 : index
    %c3_30 = arith.constant 3 : index
    %c0_31 = arith.constant 0 : index
    %c0_32 = arith.constant 0 : index
    %41 = vector.load %arg2[%c0_29, %c3_30, %c0_31, %c0_32] : memref<1x4x2x128xf32, #tpu.memory_space<vmem>>, vector<1x1x2x128xf32>
    %42 = vector.shape_cast %41 : vector<1x1x2x128xf32> to vector<2x128xf32>
    %43 = arith.subf %42, %14 : vector<2x128xf32>
    %44 = math.exp %43 : vector<2x128xf32>
    %45 = arith.addf %37, %44 : vector<2x128xf32>
    %c3_i32 = arith.constant 3 : i32
    %46 = vector.broadcast %c3_i32 : i32 to vector<2x128xi32>
    %47 = arith.cmpi eq, %1, %46 : vector<2x128xi32>
    %48 = arith.select %47, %42, %40 : vector<2x128xi1>, vector<2x128xf32>
    %49 = math.log %45 : vector<2x128xf32>
    %50 = arith.addf %14, %49 : vector<2x128xf32>
    %51 = arith.subf %50, %48 : vector<2x128xf32>
    %cst_33 = arith.constant 0.000000e+00 : f32
    %52 = vector.broadcast %cst_33 : f32 to vector<2x128xf32>
    %53 = arith.select %3, %51, %52 : vector<2x128xi1>, vector<2x128xf32>
    %cst_34 = arith.constant dense<0.000000e+00> : vector<128xf32>
    %54 = vector.multi_reduction <add>, %53, %cst_34 [0] : vector<2x128xf32> to vector<128xf32>
    %55 = vector.shape_cast %54 : vector<128xf32> to vector<1x128xf32>
    %56 = vector.shape_cast %55 : vector<1x128xf32> to vector<1x1x128xf32>
    %c0_35 = arith.constant 0 : index
    %c0_36 = arith.constant 0 : index
    %c0_37 = arith.constant 0 : index
    %57 = vector.load %arg4[%c0_35, %c0_36, %c0_37] : memref<1x1x128xf32, #tpu.memory_space<vmem>>, vector<1x1x128xf32>
    tpu.vector_store %arg4[%c0_35, %c0_36, %c0_37], %56 {strides = array<i32>} : memref<1x1x128xf32, #tpu.memory_space<vmem>>, vector<1x1x128xf32>,
    %58 = arith.extui %3 : vector<2x128xi1> to vector<2x128xi32>
    %59 = arith.sitofp %58 : vector<2x128xi32> to vector<2x128xf32>
    %cst_38 = arith.constant dense<0.000000e+00> : vector<128xf32>
    %60 = vector.multi_reduction <add>, %59, %cst_38 [0] : vector<2x128xf32> to vector<128xf32>
    %61 = vector.shape_cast %60 : vector<128xf32> to vector<1x128xf32>
    %62 = vector.shape_cast %61 : vector<1x128xf32> to vector<1x1x128xf32>
    %c0_39 = arith.constant 0 : index
    %c0_40 = arith.constant 0 : index
    %c0_41 = arith.constant 0 : index
    %63 = vector.load %arg5[%c0_39, %c0_40, %c0_41] : memref<1x1x128xf32, #tpu.memory_space<vmem>>, vector<1x1x128xf32>
    tpu.vector_store %arg5[%c0_39, %c0_40, %c0_41], %62 {strides = array<i32>} : memref<1x1x128xf32, #tpu.memory_space<vmem>>, vector<1x1x128xf32>,
    return
  }
  func.func @transform_0(%arg0: i32, %arg1: i32) -> (i32, i32, i32, i32) {
    %c0_i32 = arith.constant 0 : i32
    %c0_i32_0 = arith.constant 0 : i32
    %c0_i32_1 = arith.constant 0 : i32
    return %arg0, %c0_i32, %arg1, %c0_i32_0 : i32, i32, i32, i32
  }
  func.func @transform_1(%arg0: i32, %arg1: i32) -> (i32, i32, i32, i32) {
    %c0_i32 = arith.constant 0 : i32
    %c0_i32_0 = arith.constant 0 : i32
    %c0_i32_1 = arith.constant 0 : i32
    return %arg0, %c0_i32, %arg1, %c0_i32_0 : i32, i32, i32, i32
  }
  func.func @transform_2(%arg0: i32, %arg1: i32) -> (i32, i32, i32) {
    %c0_i32 = arith.constant 0 : i32
    %c0_i32_0 = arith.constant 0 : i32
    return %arg0, %arg1, %c0_i32 : i32, i32, i32
  }
  func.func @transform_3(%arg0: i32, %arg1: i32) -> (i32, i32, i32) {
    %c0_i32 = arith.constant 0 : i32
    %c0_i32_0 = arith.constant 0 : i32
    return %arg0, %arg1, %c0_i32 : i32, i32, i32
  }
}

</mosaic_0001>

<bundles_post_ra>
// kernel: tpu_custom_call.1
= control target key start
LH: loop header
LB: loop body
LE: loop exit
PB: predicated region body
PF: predicated region fallthrough
CT: control target
= control target key end

     0   :  { %9 = vsyncpa [#allocation3], 0  ;;  %s1082_s0 = inlined_call_operand.hbm [shape: f32[2,4,2,128], index: 0, kind: input, shape index: {}]   ;;  %s1083_s1 = inlined_call_operand.hbm [shape: s32[2,1,2,128], index: 1, kind: input, shape index: {}]   ;;  %s1084_s2 = inlined_call_operand.hbm [shape: f32[2,1,128], index: 2, kind: output, shape index: {0}]   ;;  %s1085_s3 = inlined_call_operand.hbm [shape: f32[2,1,128], index: 3, kind: output, shape index: {1}]  }
   0x1   :  { %11 = vsyncpa [#allocation3 + $0x1], 0 }
   0x2   :  { %12 = vsyncpa [#allocation6], 0 }
   0x3   :  { %14 = vsyncpa [#allocation6 + $0x1], 0 }
   0x4   :  { %15 = vsyncpa [#allocation4], 0 }
   0x5   :  { %17 = vsyncpa [#allocation4 + $0x1], 0 }
   0x6   :  { %18 = vsyncpa [#allocation9], 0 }
   0x7   :  { %20 = vsyncpa [#allocation9 + $0x1], 0  ;;  %s792_s12 = smov 0   ;;  %s794_s13 = smov 0  }
   0x8   :  { %s796_s14 = smov 0   ;;  %s798_s15 = smov 0  }
   0x9   :  { %s800_s16 = smov 0   ;;  %s802_s17 = smov 0  }
   0xa LB: > { %s479_s18 = sadd.s32 4294967295, %s763_s17   ;;  %s480_s19 = sadd.s32 4294967294, %s763_s17   ;;  %s763_s17 = sphi %s802_s17, %s26_s17   ;;  %s759_s16 = sphi %s800_s16, %s1104_s16   ;;  %s755_s15 = sphi %s798_s15, %s1103_s15   ;;  %s751_s14 = sphi %s796_s14, %s1102_s14   ;;  %s747_s13 = sphi %s794_s13, %s1101_s13   ;;  %s743_s12 = sphi %s792_s12, %s1100_s12  }
   0xb   : > { %s38_s20 = sadd.s32 1, %s759_s16  ;;  %s47_s21 = sadd.s32 1, %s751_s14 }
   0xc   : > { %p40_p0 = scmp.ge.s32.totalorder %s38_s20, 2  ;;  %p54_p1 = scmp.ne.s32.totalorder %s751_s14, %s747_s13 }
   0xd   : > { %p55_p2 = scmp.eq.s32.totalorder %s763_s17, 0  ;;  %p60_p3 = scmp.ne.s32.totalorder %s747_s13, %s743_s12 }
   0xe   : > { %s1106_s20 = smov (%p40_p0, %s38_s20), 0  ;;  %p61_p5 = scmp.eq.s32.totalorder %s479_s18, 0 }
   0xf   : > { %p833_p4 = por %p55_p2, %p54_p1  ;;  %s42_s23 = ssub.s32 %s759_s16, %s1106_s20 }
  0x10   : > { %p114_p6 = scmp.eq.s32.totalorder %s479_s18, 1  ;;  %p45_p7 = scmp.eq.s32.totalorder %s42_s23, 0 }
  0x11   : > { %p839_p8 = por %p61_p5, %p60_p3  ;;  %p120_p10 = scmp.eq.s32.totalorder %s480_s19, 1 }
  0x12   : > { %p843_p9 = por %p114_p6, %p54_p1  ;;  %p522_p13 = scmp.lt.s32.totalorder %s763_s17, 2 }
  0x13   : > { %s1089_s24 = scalar_select %p839_p8, 1, 0 }
  0x14   : > { %s1090_s25 = scalar_select %p843_p9, 1, 0 }
  0x15   : > { %s848_s26 = scalar_select %p45_p7, %s751_s14, %s47_s21  }
  0x16   : > { %p850_p11 = por %p120_p10, %p60_p3  ;;  %s857_s28 = sand.u32 1, %s751_s14  }
  0x17   : > { %s483_s29 = sshll.u32 %s857_s28, 3  ;;  %s499_s30 = sshll.u32 %s759_s16, 7 }
  0x18   : > { %s1091_s27 = scalar_select %p850_p11, 1, 0 }
  0x19   : > { %s864_s6 = scalar_lea.hbm %s1082_s0, %s499_s30  ;;  %s172_s7 = scalar_lea.vmem [#allocation2], %s483_s29 }
  0x1a   : > { %s180_s8 = sshll.u32 %s172_s7, 4  ;;  %p870_p0 = pnand %p522_p13, %p833_p4  ;;  %s866_s8 = int_to_ptr.vmem [resolvable:$true] %s180_s8 }
  0x1b   : > { %s169_s10 = scalar_lea.sflag [#allocation3], %s857_s28  ;;  %s585_s11 = scalar_lea.hbm %s864_s6, 128 }
  0x1c   : > { %p586_p2 = scmp.ne.s32.totalorder %s864_s6, %s585_s11  ;;  %p587_p3 = pneg %p870_p0 }
  0x1d   : > { %s590_s21 = scalar_lea.hbm %s1082_s0, 256  ;;  %p591_p4 = scmp.lt.u32.totalorder %s864_s6, %s1082_s0 }
  0x1e   : > { %p588_p5 = pnand %p587_p3, %p586_p2  ;;  %p592_p7 = scmp.lt.u32.totalorder %s590_s21, %s585_s11 }
  0x1f   : > { %p594_p13 = scmp.lt.u32.totalorder %s585_s11, %s864_s6 }
  0x20   : > { %p589_p6 = pneg %p588_p5  ;;  %p593_p10 = por %p592_p7, %p591_p4 }
  0x22   : > { %p595_p12 = por %p594_p13, %p593_p10 }
  0x24   : > { %p596_p1 = pnand %p595_p12, %p589_p6 }
  0x26   : > { %599 = shalt.err (!%p596_p1)
}
  0x27   : > { %s600_s29 = scalar_lea.vmem %s866_s8, 128  ;;  %s765_s30 = smov [#allocation2]  }
  0x28   : > { %p601_p2 = scmp.ne.s32.totalorder %s866_s8, %s600_s29  ;;  %s605_s4 = sshll.u32 %s765_s30, 4  ;;  %s606_s4 = int_to_ptr.vmem [resolvable:$false] %s605_s4 }
  0x29   : > { %s607_s5 = scalar_lea.vmem %s606_s4, 256  ;;  %p608_p9 = scmp.lt.s32.totalorder %s866_s8, %s606_s4 }
  0x2a   : > { %p603_p5 = pnand %p601_p2, %p587_p3  ;;  %p609_p4 = scmp.lt.s32.totalorder %s607_s5, %s600_s29 }
  0x2c   : > { %p604_p11 = pneg %p603_p5  ;;  %p610_p7 = por %p609_p4, %p608_p9 }
  0x2e   : > { %p611_p10 = pnand %p610_p7, %p604_p11 }
  0x30   : > { %614 = shalt.err (!%p611_p10)
}
  0x31   : > { %s766_s7 = smov 32   ;;  %s767_s11 = smov 2  }
  0x32   : > { %511 = dma.hbm_to_vmem [thread:$0]  (!%p870_p0), %s864_s6, 128, %s866_s8, %s169_s10, %s766_s7, %s766_s7, %s767_s11  }
  0x33   : > { %p207_p12 = scmp.lt.s32.totalorder %s763_s17, 3  ;;  %s486_s18 = sshll.u32 %s857_s28, 1 }
  0x34   : > { %s487_s19 = sshll.u32 %s759_s16, 5  ;;  %p1093_p9 = scmp.ge.s32.totalorder %s763_s17, 1 }
  0x35   : > { %s915_s29 = scalar_lea.hbm %s1083_s1, %s487_s19  ;;  %s194_s30 = scalar_lea.vmem [#allocation5], %s486_s18 }
  0x36   : > { %p908_p11 = pnand %p1093_p9, %p207_p12  ;;  %s202_s4 = sshll.u32 %s194_s30, 4  ;;  %s203_s4 = int_to_ptr.vmem [resolvable:$true] %s202_s4 }
  0x37   : > { %s191_s6 = scalar_lea.sflag [#allocation6], %s857_s28  ;;  %s615_s8 = scalar_lea.hbm %s915_s29, 32 }
  0x38   : > { %s1094_s21 = scalar_select %p908_p11, 1, 0 }
  0x39   : > { %p616_p1 = scmp.ne.s32.totalorder %s915_s29, %s615_s8  ;;  %s620_s7 = scalar_lea.hbm %s1083_s1, 64 }
  0x3a   : > { %p621_p2 = scmp.lt.u32.totalorder %s915_s29, %s1083_s1  ;;  %p622_p5 = scmp.lt.u32.totalorder %s620_s7, %s615_s8 }
  0x3b   : > { %p618_p6 = pnand %p616_p1, %p587_p3  ;;  %p624_p7 = scmp.lt.u32.totalorder %s615_s8, %s915_s29 }
  0x3c   : > { %p623_p4 = por %p622_p5, %p621_p2 }
  0x3d   : > { %p619_p13 = pneg %p618_p6 }
  0x3e   : > { %p625_p10 = por %p624_p7, %p623_p4 }
  0x40   : > { %p626_p12 = pnand %p625_p10, %p619_p13 }
  0x42   : > { %629 = shalt.err (!%p626_p12)
}
  0x43   : > { %s630_s28 = scalar_lea.vmem %s203_s4, 32  ;;  %s768_s18 = smov [#allocation5]  }
  0x44   : > { %p631_p9 = scmp.ne.s32.totalorder %s203_s4, %s630_s28  ;;  %s635_s22 = sshll.u32 %s768_s18, 4  ;;  %s636_s22 = int_to_ptr.vmem [resolvable:$false] %s635_s22 }
  0x45   : > { %s637_s23 = scalar_lea.vmem %s636_s22, 64  ;;  %p638_p8 = scmp.lt.s32.totalorder %s203_s4, %s636_s22 }
  0x46   : > { %p633_p1 = pnand %p631_p9, %p587_p3  ;;  %p639_p11 = scmp.lt.s32.totalorder %s637_s23, %s630_s28 }
  0x48   : > { %p634_p6 = pneg %p633_p1  ;;  %p640_p2 = por %p639_p11, %p638_p8 }
  0x4a   : > { %p641_p5 = pnand %p640_p2, %p634_p6 }
  0x4c   : > { %644 = shalt.err (!%p641_p5)
}
  0x4d   : > { %514 = dma.hbm_to_vmem [thread:$0]  (!%p870_p0), %s915_s29, 32, %s203_s4, %s191_s6  }
  0x4e   : > { %p1095_p13 = scmp.ne.s32.totalorder %s1094_s21, 0 }
  0x4f   : > { %s940_s30 = sand.u32 (!%p1095_p13), 1, %s747_s13   ;;  %p1096_p3 = scmp.ne.s32.totalorder (!%p1095_p13), %s1089_s24, 0 }
  0x50   : > { %211 = sbr.rel (%p1095_p13) target bundleno = 174 (0xae), region = 28  ;;  %s489_s8 = sshll.u32 (!%p1095_p13), %s940_s30, 3 }
  0x51   : > { %s214_s10 = scalar_lea.sflag (!%p1095_p13), [#allocation3], %s940_s30  ;;  %s217_s5 = scalar_lea.vmem (!%p1095_p13), [#allocation2], %s489_s8 }
  0x57   : > { %726 = dma.done.wait (%p1096_p3), %s214_s10, 128  }
  0x58   : > { %728 = vsyncadd (%p1096_p3), %s214_s10, 4294967168  ;;  %s490_s9 = sshll.u32 %s940_s30, 1  ;;  %s223_s21 = scalar_lea.sflag [#allocation6], %s940_s30 }
  0x59   : > { %s226_s29 = scalar_lea.vmem [#allocation5], %s490_s9 }
  0x5a   : > { %730 = dma.done.wait (%p1096_p3), %s223_s21, 32  }
  0x5b   : > { %732 = vsyncadd (%p1096_p3), %s223_s21, 4294967264  ;;  %v954_v0 = vld [vmem:[%s226_s29] sm:$0x3]  ;;  %v956_v1 = vld [vmem:[%s217_s5] sm:$0x3]  ;;  %vm298_vm1 = vcmask 1041408  }
  0x5c   : > { %v958_v2 = vld [vmem:[%s217_s5 + $0x2] sm:$0x3]  ;;  %vm258_vm0 = vcmp.ne.s32.totalorder %v954_v0, 255  ;;  %v963_v4 = vld [vmem:[%s217_s5 + $0x4] sm:$0x3]  ;;  %v769_v7 = vmov 0.0  }
  0x5d   : > { %v262_v3 = vmax.f32 %v956_v1, %v958_v2  ;;  %v965_v5 = vld [vmem:[%s217_s5 + $0x6] sm:$0x3]  ;;  %v494_v8 = vsel %vm258_vm0, 1.0, %v769_v7  ;;  %s256_s24 = scalar_lea.vmem [#allocation8], %s940_s30  ;;  %s495_s6 = sshll.u32 %s755_s15, 4 }
  0x5e   : > { %v309_v9 = vsel %vm298_vm1, %v494_v8, 0.0  ;;  %s349_s4 = sshll.u32 %s256_s24, 4  ;;  %s991_s19 = scalar_lea.hbm %s1085_s3, %s495_s6  ;;  %s984_s4 = int_to_ptr.vmem [resolvable:$true] %s349_s4 }
  0x5f   : > { %v265_v6 = vmax.f32 %v262_v3, %v963_v4  ;;  %v310_v11 = vrot.slane %v309_v9, 4  ;;  %s322_s28 = scalar_lea.sflag [#allocation9], %s940_s30  ;;  %s645_s18 = scalar_lea.vmem %s984_s4, 16 }
  0x60   : > { %p646_p8 = scmp.ne.s32.totalorder %s984_s4, %s645_s18  ;;  %p1097_p0 = scmp.ne.s32.totalorder %s1090_s25, 0 }
  0x61   : > { %v972_v10 = vmax.f32 %v265_v6, %v965_v5  ;;  %v311_v16 = vadd.f32 %v310_v11, %v309_v9  ;;  %s770_s22 = smov [#allocation8]  }
  0x62   : > { %p647_p11 = pnand %p646_p8, %p1097_p0  ;;  %s649_s23 = sshll.u32 %s770_s22, 4  ;;  %s650_s23 = int_to_ptr.vmem [resolvable:$false] %s649_s23 }
  0x63   : > { %v269_v12 = vsub.f32 %v956_v1, %v972_v10  ;;  %v275_v13 = vsub.f32 %v958_v2, %v972_v10  ;;  %v281_v14 = vsub.f32 %v963_v4, %v972_v10  ;;  %v287_v15 = vsub.f32 %v965_v5, %v972_v10  ;;  %s651_s8 = scalar_lea.vmem %s650_s23, 32  ;;  %p652_p7 = scmp.lt.s32.totalorder %s984_s4, %s650_s23 }
  0x64   : > { %v312_v21 = vrot.slane %v311_v16, 2  ;;  %p648_p4 = pneg %p647_p11  ;;  %p653_p10 = scmp.lt.s32.totalorder %s651_s8, %s645_s18 }
  0x65   : > { %v270_v17 = vmul.f32 1.442695, %v269_v12  ;;  %v276_v18 = vmul.f32 1.442695, %v275_v13  ;;  %v282_v19 = vmul.f32 1.442695, %v281_v14 }
  0x66   : > { %v288_v20 = vmul.f32 1.442695, %v287_v15  ;;  %v313_v22 = vadd.f32 %v312_v21, %v311_v16  ;;  %p654_p12 = por %p653_p10, %p652_p7 }
  0x67   : > { %575 = vpow2.f32 %v270_v17 }
  0x68   : > { %577 = vpow2.f32 %v276_v18  ;;  %v314_v23 = vrot.slane %v313_v22, 1  ;;  %p655_p9 = pnand %p654_p12, %p648_p4 }
  0x69   : > { %579 = vpow2.f32 %v282_v19 }
  0x6a   : > { %581 = vpow2.f32 %v288_v20  ;;  %v315_v24 = vadd.f32 %v314_v23, %v313_v22 }
  0x6c   : > { %316 = vst [vmem:[%s256_s24] sm:$0x1] %v315_v24 }
  0x6d   : > { %658 = shalt.err (!%p655_p9)
}
  0x6e   : > { %s659_s10 = scalar_lea.hbm %s991_s19, 16  ;;  %s663_s21 = scalar_lea.hbm %s1085_s3, 32 }
  0x6f   : > { %p660_p1 = scmp.ne.s32.totalorder %s991_s19, %s659_s10  ;;  %p664_p5 = scmp.lt.u32.totalorder %s991_s19, %s1085_s3 }
  0x70   : > { %p665_p13 = scmp.lt.u32.totalorder %s663_s21, %s659_s10  ;;  %p667_p8 = scmp.lt.u32.totalorder %s659_s10, %s991_s19 }
  0x71   : > { %p661_p6 = pnand %p660_p1, %p1097_p0 }
  0x72   : > { %p666_p3 = por %p665_p13, %p664_p5 }
  0x73   : > { %p662_p2 = pneg %p661_p6 }
  0x74   : > { %p668_p11 = por %p667_p8, %p666_p3 }
  0x76   : > { %p669_p4 = pnand %p668_p11, %p662_p2 }
  0x78   : > { %672 = shalt.err (!%p669_p4)
}
  0x79   : > { %505 = dma.vmem_to_hbm [thread:$0]  (%p1097_p0), %s984_s4, 16, %s991_s19, %s322_s28   ;;  %v576_v25 = vpop.eup %575  ;;  %vm273_vm2 = vcmp.eq.s32.totalorder %v954_v0, 0  ;;  %vm279_vm3 = vcmp.eq.s32.totalorder %v954_v0, 1  ;;  %vm285_vm4 = vcmp.eq.s32.totalorder %v954_v0, 2  ;;  %vm291_vm5 = vcmp.eq.s32.totalorder %v954_v0, 3 }
  0x7a   : > { %v578_v26 = vpop.eup %577  ;;  %v274_v32 = vsel %vm273_vm2, %v956_v1, 0.0  ;;  %s250_s4 = scalar_lea.vmem [#allocation7], %s940_s30  ;;  %s1035_s28 = scalar_lea.hbm %s1084_s2, %s495_s6 }
  0x7b   : > { %v580_v27 = vpop.eup %579  ;;  %v278_v28 = vadd.f32 %v578_v26, %v576_v25  ;;  %v280_v33 = vsel %vm279_vm3, %v958_v2, %v274_v32  ;;  %s335_s7 = sshll.u32 %s250_s4, 4  ;;  %s318_s18 = scalar_lea.sflag [#allocation4], %s940_s30  ;;  %s1028_s7 = int_to_ptr.vmem [resolvable:$true] %s335_s7 }
  0x7c   : > { %v582_v29 = vpop.eup %581  ;;  %v286_v34 = vsel %vm285_vm4, %v963_v4, %v280_v33  ;;  %s673_s22 = scalar_lea.vmem %s1028_s7, 16  ;;  %s771_s23 = smov [#allocation7]  }
  0x7d   : > { %v284_v30 = vadd.f32 %v580_v27, %v278_v28  ;;  %v292_v37 = vsel %vm291_vm5, %v965_v5, %v286_v34  ;;  %p674_p7 = scmp.ne.s32.totalorder %s1028_s7, %s673_s22  ;;  %s677_s8 = sshll.u32 %s771_s23, 4  ;;  %s678_s8 = int_to_ptr.vmem [resolvable:$false] %s677_s8 }
  0x7e   : > { %s679_s10 = scalar_lea.vmem %s678_s8, 32  ;;  %p680_p9 = scmp.lt.s32.totalorder %s1028_s7, %s678_s8 }
  0x7f   : > { %v290_v31 = vadd.f32 %v582_v29, %v284_v30  ;;  %p675_p10 = pnand %p674_p7, %p1097_p0  ;;  %p681_p1 = scmp.lt.s32.totalorder %s679_s10, %s673_s22 }
  0x81   : > { %583 = vlog2.f32 %v290_v31  ;;  %p676_p12 = pneg %p675_p10  ;;  %p682_p6 = por %p681_p1, %p680_p9 }
  0x83   : > { %p683_p2 = pnand %p682_p6, %p676_p12 }
  0x8b   : > { %v584_v35 = vpop.eup %583 }
  0x8c   : > { %v294_v36 = vmul.f32 0.6931472, %v584_v35 }
  0x8e   : > { %v295_v38 = vadd.f32 %v294_v36, %v972_v10 }
  0x90   : > { %v296_v39 = vsub.f32 %v295_v38, %v292_v37 }
  0x92   : > { %v297_v40 = vsel %vm258_vm0, %v296_v39, 0.0 }
  0x93   : > { %v299_v41 = vsel %vm298_vm1, %v297_v40, 0.0 }
  0x94   : > { %v300_v42 = vrot.slane %v299_v41, 4 }
  0x96   : > { %v301_v43 = vadd.f32 %v300_v42, %v299_v41 }
  0x98   : > { %v302_v44 = vrot.slane %v301_v43, 2 }
  0x9a   : > { %v303_v45 = vadd.f32 %v302_v44, %v301_v43 }
  0x9c   : > { %v304_v46 = vrot.slane %v303_v45, 1 }
  0x9e   : > { %v305_v47 = vadd.f32 %v304_v46, %v303_v45 }
  0xa0   : > { %306 = vst [vmem:[%s250_s4] sm:$0x1] %v305_v47 }
  0xa1   : > { %686 = shalt.err (!%p683_p2)
}
  0xa2   : > { %s687_s15 = scalar_lea.hbm %s1035_s28, 16  ;;  %s691_s5 = scalar_lea.hbm %s1084_s2, 32 }
  0xa3   : > { %p688_p5 = scmp.ne.s32.totalorder %s1035_s28, %s687_s15  ;;  %p692_p8 = scmp.lt.u32.totalorder %s1035_s28, %s1084_s2 }
  0xa4   : > { %p693_p11 = scmp.lt.u32.totalorder %s691_s5, %s687_s15  ;;  %p695_p7 = scmp.lt.u32.totalorder %s687_s15, %s1035_s28 }
  0xa5   : > { %p689_p13 = pnand %p688_p5, %p1097_p0 }
  0xa6   : > { %p694_p4 = por %p693_p11, %p692_p8 }
  0xa7   : > { %p690_p3 = pneg %p689_p13 }
  0xa8   : > { %p696_p10 = por %p695_p7, %p694_p4 }
  0xaa   : > { %p697_p12 = pnand %p696_p10, %p690_p3 }
  0xac   : > { %700 = shalt.err (!%p697_p12)
}
  0xad   : > { %504 = dma.vmem_to_hbm [thread:$0]  (%p1097_p0), %s1028_s7, 16, %s1035_s28, %s318_s18  }
  0xae PF: > { %s361_s29 = sand.u32 1, %s743_s12   ;;  %p1098_p9 = scmp.ne.s32.totalorder %s1091_s27, 0 }
  0xaf   : > { %p1099_p1 = scmp.ge.s32.totalorder %s763_s17, 2  ;;  %s362_s24 = scalar_lea.sflag [#allocation4], %s361_s29 }
  0xb1   : > { %p516_p6 = pnand %p1099_p1, %p1098_p9 }
  0xb3   : > { %734 = dma.done.wait (!%p516_p6), %s362_s24, 16  }
  0xb4   : > { %736 = vsyncadd (!%p516_p6), %s362_s24, 4294967280  ;;  %s370_s4 = scalar_lea.sflag [#allocation9], %s361_s29 }
  0xb5   : > { %738 = dma.done.wait (!%p516_p6), %s370_s4, 16  }
  0xb6   : > { %740 = vsyncadd (!%p516_p6), %s370_s4, 4294967280  ;;  %s26_s17 = sadd.s32 1, %s763_s17   ;;  %s1100_s12 = smov %s747_s13 }
  0xb7   : > { %p23_p2 = scmp.ge.s32.totalorder %s26_s17, 4   ;;  %s1101_s13 = smov %s751_s14 }
  0xb8   : > { %s1102_s14 = smov %s848_s26  ;;  %s1103_s15 = smov %s759_s16 }
  0xb9   : > { %s1104_s16 = smov %s1106_s20  ;;  %25 = sbr.rel (!%p23_p2) target bundleno = 10 (0xa), region = 106 }
  0xc0   :  { %374 = vsyncpa [#allocation3], 1 }
  0xc1   :  { %376 = vsyncpa [#allocation3 + $0x1], 1 }
  0xc2   :  { %377 = vsyncpa [#allocation6], 1 }
  0xc3   :  { %379 = vsyncpa [#allocation6 + $0x1], 1 }
  0xc4   :  { %380 = vsyncpa [#allocation4], 1 }
  0xc5   :  { %382 = vsyncpa [#allocation4 + $0x1], 1 }
  0xc6   :  { %383 = vsyncpa [#allocation9], 1 }
  0xc7   :  { %385 = vsyncpa [#allocation9 + $0x1], 1 }

</bundles_post_ra>
